<compile_context>
chip_gen: v7x
topology: tpu7x:2x2x1
jax: 0.10.0
libtpu: 0.0.40
codegen_flags: <defaults>
</compile_context>

<pallas_src>
import functools

import jax
import jax.numpy as jnp
from jax.experimental import pallas as pl
from jax.experimental.pallas import tpu as pltpu


def _round_up(n, m):
    return ((n + m - 1) // m) * m


def _prenet_kernel(*refs, training: bool):
    if training:
        x_ref, w1_ref, b1_ref, w2_ref, b2_ref, m1_ref, m2_ref, o_ref = refs
    else:
        x_ref, w1_ref, b1_ref, w2_ref, b2_ref, o_ref = refs

    # ---- layer 1: Linear -> ReLU -> Dropout --------------------------------
    h = jnp.dot(x_ref[...], w1_ref[...], preferred_element_type=jnp.float32)
    h = jnp.maximum(h + b1_ref[...], 0.0)          # (T, H) + (1, H) broadcast
    if training:
        # mask is pre-scaled by 1/(1-p) in the wrapper: one mul, no compare,
        # no int->float convert inside the kernel.
        h = h * m1_ref[...]

    # ---- layer 2: Linear -> ReLU -> Dropout --------------------------------
    h = h.astype(w2_ref.dtype)                     # identity for f32 I/O
    y = jnp.dot(h, w2_ref[...], preferred_element_type=jnp.float32)
    y = jnp.maximum(y + b2_ref[...], 0.0)
    if training:
        y = y * m2_ref[...]

    o_ref[...] = y.astype(o_ref.dtype)


def _make_dropout_masks(key, shape, drop_p, dtype):
    """Inverted-dropout masks: 0 where dropped, 1/(1-p) where kept."""
    k1, k2 = jax.random.split(key)
    scale = 1.0 / (1.0 - drop_p)
    m1 = jax.random.bernoulli(k1, 1.0 - drop_p, shape).astype(dtype) * scale
    m2 = jax.random.bernoulli(k2, 1.0 - drop_p, shape).astype(dtype) * scale
    return m1, m2


def prenet_forward(x, w1_t, b1, w2_t, b2, *, drop_p, training,
                   rng_key=None, tile_n=1024):
    """x: [N, in_dim]; w1_t: [in_dim, out_dim]; w2_t: [out_dim, out_dim].

    Works with f32 or bf16 I/O (accumulation is always f32 on the MXU).
    """
    N, in_dim = x.shape
    out_dim = w1_t.shape[1]
    use_dropout = bool(training) and float(drop_p) > 0.0

    # Clamp the row tile for small N, and pad N up to a multiple of the tile.
    tile_n = max(8, min(int(tile_n), _round_up(N, 8)))
    n_pad = _round_up(N, tile_n)
    if n_pad != N:
        x = jnp.pad(x, ((0, n_pad - N), (0, 0)))

    b1r = b1.reshape(1, out_dim)
    b2r = b2.reshape(1, out_dim)

    inputs = [x, w1_t, b1r, w2_t, b2r]
    in_specs = [
        pl.BlockSpec((tile_n, in_dim), lambda i: (i, 0)),
        pl.BlockSpec((in_dim, out_dim), lambda i: (0, 0)),
        pl.BlockSpec((1, out_dim), lambda i: (0, 0)),
        pl.BlockSpec((out_dim, out_dim), lambda i: (0, 0)),
        pl.BlockSpec((1, out_dim), lambda i: (0, 0)),
    ]

    if use_dropout:
        if rng_key is None:
            rng_key = jax.random.PRNGKey(0)
        m1, m2 = _make_dropout_masks(rng_key, (n_pad, out_dim),
                                     float(drop_p), x.dtype)
        inputs += [m1, m2]
        in_specs += [
            pl.BlockSpec((tile_n, out_dim), lambda i: (i, 0)),
            pl.BlockSpec((tile_n, out_dim), lambda i: (i, 0)),
        ]

    kernel = functools.partial(_prenet_kernel, training=use_dropout)

    out = pl.pallas_call(
        kernel,
        grid=(n_pad // tile_n,),
        in_specs=in_specs,
        out_specs=pl.BlockSpec((tile_n, out_dim), lambda i: (i, 0)),
        out_shape=jax.ShapeDtypeStruct((n_pad, out_dim), x.dtype),
        compiler_params=pltpu.CompilerParams(
            dimension_semantics=("parallel",)),
    )(*inputs)

    return out[:N]


def prenet_reference(x, w1_t, b1, w2_t, b2, m1=None, m2=None):
    """Pure-JAX reference. m1/m2 are pre-scaled dropout masks (or None)."""
    h = jnp.maximum(x @ w1_t + b1, 0.0)
    if m1 is not None:
        h = h * m1
    y = jnp.maximum(h @ w2_t + b2, 0.0)
    if m2 is not None:
        y = y * m2
    return y


if __name__ == "__main__":
    # Module config: Prenet(in_dim=32, out_dim=64, drop_out_p=0.5)
    in_dim, out_dim, drop_p = 32, 64, 0.5
    batch, seq = 2, 8
    N = batch * seq

    key = jax.random.PRNGKey(0)
    kx, kw1, kb1, kw2, kb2, kdrop = jax.random.split(key, 6)

    # Deterministic parameter init (PyTorch nn.Linear stores W as [out, in]).
    w1 = jax.random.uniform(kw1, (out_dim, in_dim), jnp.float32, -0.1, 0.1)
    b1 = jax.random.uniform(kb1, (out_dim,), jnp.float32, -0.1, 0.1)
    w2 = jax.random.uniform(kw2, (out_dim, out_dim), jnp.float32, -0.1, 0.1)
    b2 = jax.random.uniform(kb2, (out_dim,), jnp.float32, -0.1, 0.1)

    x = jax.random.normal(kx, (batch, seq, in_dim), jnp.float32)
    x2d = x.reshape(N, in_dim)

    # ---- eval mode: dropout is identity; must match the reference exactly --
    y_eval = prenet_forward(x2d, w1.T, b1, w2.T, b2,
                            drop_p=drop_p, training=False)
    y_eval = jax.block_until_ready(y_eval)
    y_ref = prenet_reference(x2d, w1.T, b1, w2.T, b2)
    assert jnp.allclose(y_eval, y_ref, atol=1e-5, rtol=1e-5), \
        "eval-mode mismatch vs reference"

    # ---- training mode: same masks reproduced outside for an exact check ---
    y_train = prenet_forward(x2d, w1.T, b1, w2.T, b2,
                             drop_p=drop_p, training=True, rng_key=kdrop)
    y_train = jax.block_until_ready(y_train)
    m1, m2 = _make_dropout_masks(kdrop, (N, out_dim), drop_p, x2d.dtype)
    y_train_ref = prenet_reference(x2d, w1.T, b1, w2.T, b2, m1, m2)
    assert jnp.allclose(y_train, y_train_ref, atol=1e-5, rtol=1e-5), \
        "training-mode mismatch vs reference"

    # Restore the [batch, seq, out_dim] leading-dim convention of nn.Linear.
    y_out = y_eval.reshape(batch, seq, out_dim)
    assert y_out.shape == (batch, seq, out_dim)

    print("KERNEL_OK")
</pallas_src>

<mosaic_0001>
module attributes {stable_mosaic.version = 11 : i64} {
  func.func @_prenet_kernel(%arg0: i32, %arg1: memref<16x32xf32, #tpu.memory_space<vmem>>, %arg2: memref<32x64xf32, #tpu.memory_space<vmem>>, %arg3: memref<1x64xf32, #tpu.memory_space<vmem>>, %arg4: memref<64x64xf32, #tpu.memory_space<vmem>>, %arg5: memref<1x64xf32, #tpu.memory_space<vmem>>, %arg6: memref<16x64xf32, #tpu.memory_space<vmem>>) attributes {dimension_semantics = [#tpu.dimension_semantics<parallel>], iteration_bounds = array<i64: 1>, scalar_prefetch = 0 : i64, scratch_operands = 0 : i64, tpu.core_type = #tpu.core_type<tc>, window_params = [{transform_indices = @transform_0, window_bounds = array<i64: 16, 32>}, {pipeline_mode = #tpu.pipeline_mode<synchronous>, transform_indices = @transform_1, window_bounds = array<i64: 32, 64>}, {pipeline_mode = #tpu.pipeline_mode<synchronous>, transform_indices = @transform_2, window_bounds = array<i64: 1, 64>}, {pipeline_mode = #tpu.pipeline_mode<synchronous>, transform_indices = @transform_3, window_bounds = array<i64: 64, 64>}, {pipeline_mode = #tpu.pipeline_mode<synchronous>, transform_indices = @transform_4, window_bounds = array<i64: 1, 64>}, {transform_indices = @transform_5, window_bounds = array<i64: 16, 64>}]} {
    %c0 = arith.constant 0 : index
    %c0_0 = arith.constant 0 : index
    %0 = vector.load %arg1[%c0, %c0_0] : memref<16x32xf32, #tpu.memory_space<vmem>>, vector<16x32xf32>
    %c0_1 = arith.constant 0 : index
    %c0_2 = arith.constant 0 : index
    %1 = vector.load %arg2[%c0_1, %c0_2] : memref<32x64xf32, #tpu.memory_space<vmem>>, vector<32x64xf32>
    %cst = arith.constant dense<0.000000e+00> : vector<16x64xf32>
    %2 = tpu.matmul %0, %1, %cst {dimension_numbers = #tpu.dot_dimension_numbers<[1], [0], [0], [1], [0, 0, 1, 1], [], []>} : vector<16x32xf32>, vector<32x64xf32>, vector<16x64xf32> -> vector<16x64xf32>
    %c0_3 = arith.constant 0 : index
    %c0_4 = arith.constant 0 : index
    %3 = vector.load %arg3[%c0_3, %c0_4] : memref<1x64xf32, #tpu.memory_space<vmem>>, vector<1x64xf32>
    %4 = vector.broadcast %3 : vector<1x64xf32> to vector<16x64xf32>
    %5 = arith.addf %2, %4 : vector<16x64xf32>
    %cst_5 = arith.constant 0.000000e+00 : f32
    %6 = vector.broadcast %cst_5 : f32 to vector<16x64xf32>
    %7 = arith.maximumf %5, %6 : vector<16x64xf32>
    %c0_6 = arith.constant 0 : index
    %c0_7 = arith.constant 0 : index
    %8 = vector.load %arg4[%c0_6, %c0_7] : memref<64x64xf32, #tpu.memory_space<vmem>>, vector<64x64xf32>
    %cst_8 = arith.constant dense<0.000000e+00> : vector<16x64xf32>
    %9 = tpu.matmul %7, %8, %cst_8 {dimension_numbers = #tpu.dot_dimension_numbers<[1], [0], [0], [1], [0, 0, 1, 1], [], []>} : vector<16x64xf32>, vector<64x64xf32>, vector<16x64xf32> -> vector<16x64xf32>
    %c0_9 = arith.constant 0 : index
    %c0_10 = arith.constant 0 : index
    %10 = vector.load %arg5[%c0_9, %c0_10] : memref<1x64xf32, #tpu.memory_space<vmem>>, vector<1x64xf32>
    %11 = vector.broadcast %10 : vector<1x64xf32> to vector<16x64xf32>
    %12 = arith.addf %9, %11 : vector<16x64xf32>
    %cst_11 = arith.constant 0.000000e+00 : f32
    %13 = vector.broadcast %cst_11 : f32 to vector<16x64xf32>
    %14 = arith.maximumf %12, %13 : vector<16x64xf32>
    %c0_12 = arith.constant 0 : index
    %c0_13 = arith.constant 0 : index
    %15 = vector.load %arg6[%c0_12, %c0_13] : memref<16x64xf32, #tpu.memory_space<vmem>>, vector<16x64xf32>
    tpu.vector_store %arg6[%c0_12, %c0_13], %14 {strides = array<i32>} : memref<16x64xf32, #tpu.memory_space<vmem>>, vector<16x64xf32>,
    return
  }
  func.func @transform_0(%arg0: i32) -> (i32, i32) {
    %c0_i32 = arith.constant 0 : i32
    %c0_i32_0 = arith.constant 0 : i32
    return %arg0, %c0_i32 : i32, i32
  }
  func.func @transform_1(%arg0: i32) -> (i32, i32) {
    %c0_i32 = arith.constant 0 : i32
    %c0_i32_0 = arith.constant 0 : i32
    %c0_i32_1 = arith.constant 0 : i32
    return %c0_i32, %c0_i32_0 : i32, i32
  }
  func.func @transform_2(%arg0: i32) -> (i32, i32) {
    %c0_i32 = arith.constant 0 : i32
    %c0_i32_0 = arith.constant 0 : i32
    %c0_i32_1 = arith.constant 0 : i32
    return %c0_i32, %c0_i32_0 : i32, i32
  }
  func.func @transform_3(%arg0: i32) -> (i32, i32) {
    %c0_i32 = arith.constant 0 : i32
    %c0_i32_0 = arith.constant 0 : i32
    %c0_i32_1 = arith.constant 0 : i32
    return %c0_i32, %c0_i32_0 : i32, i32
  }
  func.func @transform_4(%arg0: i32) -> (i32, i32) {
    %c0_i32 = arith.constant 0 : i32
    %c0_i32_0 = arith.constant 0 : i32
    %c0_i32_1 = arith.constant 0 : i32
    return %c0_i32, %c0_i32_0 : i32, i32
  }
  func.func @transform_5(%arg0: i32) -> (i32, i32) {
    %c0_i32 = arith.constant 0 : i32
    %c0_i32_0 = arith.constant 0 : i32
    return %arg0, %c0_i32 : i32, i32
  }
}

</mosaic_0001>

<bundles_post_ra>
// kernel: tpu_custom_call.1
= control target key start
LH: loop header
LB: loop body
LE: loop exit
PB: predicated region body
PF: predicated region fallthrough
CT: control target
= control target key end

     0   :  { %10 = vsyncpa [#allocation3], 0  ;;  %s569_s0 = inlined_call_operand.hbm [shape: f32[16,32], index: 0, kind: input, shape index: {}]   ;;  %s570_s1 = inlined_call_operand.hbm [shape: f32[32,64], index: 1, kind: input, shape index: {}]   ;;  %s571_s2 = inlined_call_operand.vmem [shape: f32[1,64], index: 2, kind: input, shape index: {}]   ;;  %s572_s3 = inlined_call_operand.hbm [shape: f32[64,64], index: 3, kind: input, shape index: {}]   ;;  %s573_s4 = inlined_call_operand.vmem [shape: f32[1,64], index: 4, kind: input, shape index: {}]   ;;  %s574_s5 = inlined_call_operand.hbm [shape: f32[16,64], index: 5, kind: output, shape index: {}]  }
   0x1   :  { %11 = vsyncpa [#allocation6], 0 }
   0x2   :  { %12 = vsyncpa [#allocation4], 0  ;;  %s454_s18 = smov [#allocation5]   ;;  %s455_s20 = smov [#allocation2]  }
   0x3   :  { %s30_s19 = sshll.u32 %s454_s18, 4  ;;  %s18_s21 = sshll.u32 %s455_s20, 4  ;;  %s31_s19 = int_to_ptr.vmem [resolvable:$true] %s30_s19  ;;  %s490_s21 = int_to_ptr.vmem [resolvable:$true] %s18_s21 }
   0x4   :  { %s360_s24 = scalar_lea.hbm %s570_s1, 512 }
   0x5   :  { %p361_p0 = scmp.ne.s32.totalorder %s570_s1, %s360_s24  ;;  %p364_p1 = scmp.lt.u32.totalorder %s360_s24, %s570_s1 }
   0x7   :  { %p366_p2 = pnand %p364_p1, %p361_p0 }
   0x9   :  { %369 = shalt.err (!%p366_p2)
}
   0xa   :  { %s370_s29 = scalar_lea.vmem %s31_s19, 512  ;;  %p375_p4 = scmp.lt.s32.totalorder %s31_s19, %s31_s19 }
   0xb   :  { %p371_p3 = scmp.ne.s32.totalorder %s31_s19, %s370_s29  ;;  %p376_p5 = scmp.lt.s32.totalorder %s370_s29, %s370_s29 }
   0xd   :  { %p377_p6 = por %p376_p5, %p375_p4 }
   0xf   :  { %p378_p7 = pnand %p377_p6, %p371_p3 }
  0x11   :  { %381 = shalt.err (!%p378_p7)
}
  0x12   :  { %s456_s30 = smov 128   ;;  %s457_s6 = smov 8  }
  0x13   :  { %36 = dma.hbm_to_vmem [thread:$0]  %s570_s1, 512, %s31_s19, [#allocation6], %s456_s30, %s456_s30, %s457_s6  }
  0x14   :  { %s382_s11 = scalar_lea.hbm %s569_s0, 256 }
  0x15   :  { %p383_p8 = scmp.ne.s32.totalorder %s569_s0, %s382_s11  ;;  %p386_p9 = scmp.lt.u32.totalorder %s382_s11, %s569_s0 }
  0x17   :  { %p388_p10 = pnand %p386_p9, %p383_p8 }
  0x19   :  { %391 = shalt.err (!%p388_p10)
}
  0x1a   :  { %s392_s16 = scalar_lea.vmem %s490_s21, 256  ;;  %p397_p12 = scmp.lt.s32.totalorder %s490_s21, %s490_s21 }
  0x1b   :  { %p393_p11 = scmp.ne.s32.totalorder %s490_s21, %s392_s16  ;;  %p398_p13 = scmp.lt.s32.totalorder %s392_s16, %s392_s16 }
  0x1d   :  { %p399_p0 = por %p398_p13, %p397_p12 }
  0x1f   :  { %p400_p1 = pnand %p399_p0, %p393_p11 }
  0x21   :  { %403 = shalt.err (!%p400_p1)
}
  0x22   :  { %24 = dma.hbm_to_vmem [thread:$0]  %s569_s0, 256, %s490_s21, [#allocation3], %s456_s30, %s456_s30, %s457_s6  }
  0x23   :  { %s458_s18 = smov [#allocation7]   ;;  %s404_s23 = scalar_lea.hbm %s572_s3, 1024 }
  0x24   :  { %s44_s19 = sshll.u32 %s458_s18, 4  ;;  %p405_p2 = scmp.ne.s32.totalorder %s572_s3, %s404_s23  ;;  %s45_s19 = int_to_ptr.vmem [resolvable:$true] %s44_s19 }
  0x25   :  { %p408_p3 = scmp.lt.u32.totalorder %s404_s23, %s572_s3 }
  0x27   :  { %p410_p4 = pnand %p408_p3, %p405_p2 }
  0x29   :  { %413 = shalt.err (!%p410_p4)
}
  0x2a   :  { %s414_s28 = scalar_lea.vmem %s45_s19, 1024  ;;  %p419_p6 = scmp.lt.s32.totalorder %s45_s19, %s45_s19 }
  0x2b   :  { %p415_p5 = scmp.ne.s32.totalorder %s45_s19, %s414_s28  ;;  %p420_p7 = scmp.lt.s32.totalorder %s414_s28, %s414_s28 }
  0x2d   :  { %p421_p8 = por %p420_p7, %p419_p6 }
  0x2f   :  { %p422_p9 = pnand %p421_p8, %p415_p5 }
  0x31   :  { %425 = shalt.err (!%p422_p9)
}
  0x32   :  { %50 = dma.hbm_to_vmem [thread:$0]  %s572_s3, 1024, %s45_s19, [#allocation6], %s456_s30, %s456_s30, %s457_s6  }
  0x33   :  { %448 = dma.done.wait [#allocation3], 256  }
  0x34   :  { %449 = vsyncadd [#allocation3], 4294967040 }
  0x35   :  { %450 = dma.done.wait [#allocation6], 1536  }
  0x36   :  { %451 = vsyncadd [#allocation6], 4294965760  ;;  %vm75_vm0 = vcmask 261120   ;;  %v64_v0 = vld [vmem:[#allocation5] sm:$0xff]  ;;  %v65_v1 = vld [vmem:[#allocation5 + $0x8] sm:$0xff]  ;;  %vm174_vm1 = vcmask 523264  }
  0x37   :  { %v66_v2 = vld [vmem:[#allocation5 + $0x10] sm:$0xff]  ;;  %v330_v3 = vpack.c.bf16 %v65_v1, %v64_v0  ;;  %v67_v4 = vld [vmem:[#allocation5 + $0x18] sm:$0xff]  ;;  %v159_v7 = vld [vmem:[#allocation7] sm:$0xff]  ;;  %s459_s9 = smov [#allocation8]  }
  0x38   :  { %v62_v5 = vld [vmem:[#allocation2] sm:$0xff]  ;;  %v334_v6 = vpack.c.bf16 %v67_v4, %v66_v2  ;;  %v160_v8 = vld [vmem:[#allocation7 + $0x8] sm:$0xff]  ;;  %v162_v11 = vld [vmem:[#allocation7 + $0x18] sm:$0xff] }
  0x39   :  { %308 = vmatprep.mubr.msk.f32.mxu0 %vm75_vm0, %v62_v5  ;;  %v161_v9 = vld [vmem:[#allocation7 + $0x10] sm:$0xff]  ;;  %331 = vmatprep.subr.bf16.mxu0 %v330_v3  ;;  %v338_v10 = vpack.c.bf16 %v160_v8, %v159_v7  ;;  %v163_v13 = vld [vmem:[#allocation7 + $0x20] sm:$0xff]  ;;  %v164_v14 = vld [vmem:[#allocation7 + $0x28] sm:$0xff] }
  0x3a   :  { %333 = vmatpush3.bf16.msra.mxu0 %v330_v3  ;;  %v342_v12 = vpack.c.bf16 %v162_v11, %v161_v9  ;;  %v346_v15 = vpack.c.bf16 %v164_v14, %v163_v13  ;;  %v63_v16 = vld [vmem:[#allocation2 + $0x8] sm:$0xff]  ;;  %v165_v17 = vld [vmem:[#allocation7 + $0x30] sm:$0xff] }
  0x3b   :  { %335 = vmatprep.subr.bf16.mxu0 %v334_v6  ;;  %339 = vmatprep.subr.bf16.mxu1 %v338_v10  ;;  %v166_v18 = vld [vmem:[#allocation7 + $0x38] sm:$0xff]  ;;  %v278_v20 = vld [vmem:[%s571_s2] ss:$0 sm:$0xff]  ;;  %s265_s2 = sshll.u32 %s459_s9, 4  ;;  %s266_s2 = int_to_ptr.vmem [resolvable:$true] %s265_s2 }
  0x3c   :  { %341 = vmatpush3.bf16.msra.mxu1 %v338_v10  ;;  %v350_v19 = vpack.c.bf16 %v166_v18, %v165_v17  ;;  %v281_v27 = vld [vmem:[%s573_s4] ss:$0 sm:$0xff]  ;;  %s426_s10 = scalar_lea.vmem %s266_s2, 256  ;;  %p431_p11 = scmp.lt.s32.totalorder %s266_s2, %s266_s2 }
  0x3d   :  { %343 = vmatprep.subr.bf16.mxu1 %v342_v12  ;;  %p427_p10 = scmp.ne.s32.totalorder %s266_s2, %s426_s10  ;;  %p432_p12 = scmp.lt.s32.totalorder %s426_s10, %s426_s10 }
  0x3e   :  { %337 = vmatpush3.bf16.msra.mxu0 %v334_v6 }
  0x3f   :  { %p433_p13 = por %p432_p12, %p431_p11 }
  0x40   :  { %345 = vmatpush3.bf16.msra.mxu1 %v342_v12 }
  0x41   :  { %309 = vmatmul.mubr.msk.f32.vlgmr.msra.gmra.mrb[0].mxu0 %vm75_vm0, %v63_v16  ;;  %347 = vmatprep.subr.bf16.mxu1 %v346_v15  ;;  %p434_p0 = pnand %p433_p13, %p427_p10 }
  0x44   :  { %349 = vmatpush3.bf16.msra.mxu1 %v346_v15 }
  0x45   :  { %351 = vmatprep.subr.bf16.mxu1 %v350_v19 }
  0x48   :  { %353 = vmatpush3.bf16.msra.mxu1 %v350_v19 }
 0x114   :  { %v310_v21 = vpop.f32.mrb[0].mxu0 }
 0x115   :  { %v154_v22 = vadd.f32 %v310_v21, %v278_v20  ;;  %v148_v23 = vpop.f32.mrb[1].mxu0 }
 0x116   :  { %v149_v24 = vadd.f32 %v278_v20, %v148_v23 }
 0x117   :  { %v158_v26 = vmax.f32 %v154_v22, 0.0 }
 0x118   :  { %v157_v25 = vmax.f32 %v149_v24, 0.0 }
 0x11a   :  { %327 = vmatprep.mubr.msk.f32.mxu1 %vm174_vm1, %v157_v25 }
 0x11b   :  { %328 = vmatmul.mubr.msk.f32.vlgmr.msra.gmra.mrb[0].mxu1 %vm174_vm1, %v158_v26 }
 0x1ee   :  { %v329_v28 = vpop.f32.mrb[0].mxu1 }
 0x1ef   :  { %v253_v29 = vadd.f32 %v329_v28, %v281_v27  ;;  %v247_v30 = vpop.f32.mrb[1].mxu1 }
 0x1f0   :  { %v248_v31 = vadd.f32 %v281_v27, %v247_v30 }
 0x1f1   :  { %v257_v32 = vmax.f32 %v253_v29, 0.0 }
 0x1f2   :  { %v256_v33 = vmax.f32 %v248_v31, 0.0 }
 0x1f3   :  { %259 = vst.msk [vmem:[#allocation8 + $0x8] sm:$0xff] %vm174_vm1, %v257_v32 }
 0x1f4   :  { %258 = vst.msk [vmem:[#allocation8] sm:$0xff] %vm174_vm1, %v256_v33 }
 0x1f5   :  { %437 = shalt.err (!%p434_p0)
}
 0x1f6   :  { %s438_s12 = scalar_lea.hbm %s574_s5, 256 }
 0x1f7   :  { %p439_p1 = scmp.ne.s32.totalorder %s574_s5, %s438_s12  ;;  %p442_p2 = scmp.lt.u32.totalorder %s438_s12, %s574_s5 }
 0x1f9   :  { %p444_p3 = pnand %p442_p2, %p439_p1 }
 0x1fb   :  { %447 = shalt.err (!%p444_p3)
}
 0x1fc   :  { %271 = dma.vmem_to_hbm [thread:$0]  %s266_s2, 256, %s574_s5, [#allocation4], %s456_s30, %s456_s30, %s457_s6  }
 0x1fd   :  { %452 = dma.done.wait [#allocation4], 256  }
 0x1fe   :  { %453 = vsyncadd [#allocation4], 4294967040 }
 0x1ff   :  { %275 = vsyncpa [#allocation3], 1 }
 0x200   :  { %276 = vsyncpa [#allocation6], 1 }
 0x201   :  { %277 = vsyncpa [#allocation4], 1 }

</bundles_post_ra>
